<compile_context>
chip_gen: v6e
topology: v6e:2x2x1
jax: 0.10.0
libtpu: 0.0.40
codegen_flags: <defaults>
</compile_context>

<pallas_src>
import functools

import jax
import jax.numpy as jnp
from jax import lax
from jax.experimental import pallas as pl
from jax.experimental.pallas import tpu as pltpu


def _round_up(v, m):
    return (v + m - 1) // m * m


def _convt_leaky_kernel(w_ref, b_ref, x_ref, o_ref, *, bt, plane_w):
    """ConvTranspose2d(1,1,3,s=1,p=1) + leaky(0.1) on `bt` packed planes.

    w_ref: (3, 3)      f32 SMEM -- spatially flipped ConvTranspose2d weight.
    b_ref: (1,)        f32 SMEM -- bias.
    x_ref: (bt, H, W)  f32 VMEM -- natural-layout input planes.
    o_ref: (bt, H, W)  f32 VMEM -- natural-layout output planes.
    """
    H = x_ref.shape[1]
    W = plane_w
    L = bt * W
    # Pad the packed lane extent to full vregs: physically free (the same
    # 128-lane vregs are computed either way) and keeps lane rolls on clean
    # 128-multiples.
    Lpad = _round_up(L, 128)

    # ---- In-kernel lane packing: (bt, H, W) -> (H, Lpad) --------------------
    parts = [x_ref[b] for b in range(bt)]
    if Lpad > L:
        parts.append(jnp.zeros((H, Lpad - L), jnp.float32))
    x = jnp.concatenate(parts, axis=-1) if len(parts) > 1 else parts[0]

    row = lax.broadcasted_iota(jnp.int32, (H, Lpad), 0)
    col = lax.broadcasted_iota(jnp.int32, (H, Lpad), 1) % W  # W pow2 -> AND
    not_top = row != 0
    not_bot = row != H - 1
    not_left = col != 0
    not_right = col != W - 1

    # Row taps via sublane rolls (XLU).  The masked rows realize the zero
    # padding of the transposed conv and neutralize the roll wrap-around.
    r_up = jnp.where(not_top, pltpu.roll(x, shift=1, axis=0), 0.0)      # x[y-1]
    r_dn = jnp.where(not_bot, pltpu.roll(x, shift=H - 1, axis=0), 0.0)  # x[y+1]

    # Per-column-offset combination of the three row taps; bias folded into
    # the centre column (no zero-init pass, no separate bias pass).
    c_left = w_ref[0, 0] * r_up + w_ref[1, 0] * x + w_ref[2, 0] * r_dn
    c_cent = w_ref[0, 1] * r_up + w_ref[1, 1] * x + w_ref[2, 1] * r_dn + b_ref[0]
    c_right = w_ref[0, 2] * r_up + w_ref[1, 2] * x + w_ref[2, 2] * r_dn

    # Column taps via lane rolls.  Plane boundaries coincide exactly with the
    # masked columns, so packing many planes side-by-side along lanes (and the
    # zero lane padding) stays correct.
    acc = c_cent
    acc = acc + jnp.where(not_left, pltpu.roll(c_left, shift=1, axis=1), 0.0)
    acc = acc + jnp.where(not_right, pltpu.roll(c_right, shift=Lpad - 1, axis=1), 0.0)

    # x7 = where(x4 > 0, x4, 0.1 * x4)
    res = jnp.where(acc > 0, acc, acc * 0.1)

    # ---- Unpack back to the natural (bt, H, W) layout -----------------------
    for b in range(bt):
        o_ref[b] = res[:, b * W:(b + 1) * W]


def _planes_per_tile(B, H, W):
    """Planes per grid step: lane-dense (up to ~1024 packed lanes), VMEM-safe
    on v7x (<= ~2 MiB of input per tile; in+out double-buffered stays far
    under the 32 MiB scoped default), and >= 2 grid steps whenever B >= 2 so
    both v7x TensorCores get work and the pipeline can overlap.  Only exact
    divisors of B are used, so there are never partial blocks."""
    plane_bytes = H * W * 4
    cap_bytes = max(1, (2 << 20) // plane_bytes)
    cap_lanes = max(1, 1024 // max(W, 1))
    cap_split = B // 2 if B >= 2 else 1
    target = max(1, min(cap_bytes, cap_lanes, cap_split))
    best = 1
    for d in range(1, min(B, target) + 1):
        if B % d == 0:
            best = d
    return best


@jax.jit
def conv_transpose_leaky(x, weight, bias):
    """x: (N, 1, H, W) f32; weight: (1, 1, 3, 3) ConvTranspose2d weight;
    bias: (1,) f32.  Returns where(y > 0, y, 0.1 * y) for
    y = conv_transpose2d(x, weight, bias, stride=1, padding=1).

    All HBM I/O stays in the natural layout (the reshapes below only collapse
    leading dims and are copy-free); lane packing happens inside the kernel."""
    N, C, H, W = x.shape
    assert C == 1 and weight.shape == (1, 1, 3, 3) and bias.shape == (1,)
    B = N * C

    # ConvTranspose2d(stride=1, padding=1, k=3) == correlation with the
    # spatially flipped kernel and padding 1 (padding realized via in-kernel
    # boundary masks).
    w_flipped = weight[0, 0, ::-1, ::-1].astype(jnp.float32)

    xr = x.astype(jnp.float32).reshape(B, H, W)  # copy-free

    bt = _planes_per_tile(B, H, W)
    grid = (B // bt,)

    out = pl.pallas_call(
        functools.partial(_convt_leaky_kernel, bt=bt, plane_w=W),
        out_shape=jax.ShapeDtypeStruct((B, H, W), jnp.float32),
        grid=grid,
        in_specs=[
            pl.BlockSpec(memory_space=pltpu.SMEM),           # (3, 3) flipped weight
            pl.BlockSpec(memory_space=pltpu.SMEM),           # (1,) bias
            pl.BlockSpec((bt, H, W), lambda i: (i, 0, 0)),   # natural-layout planes
        ],
        out_specs=pl.BlockSpec((bt, H, W), lambda i: (i, 0, 0)),
        compiler_params=pltpu.CompilerParams(
            dimension_semantics=("parallel",)),  # independent batch tiles
    )(w_flipped, bias.astype(jnp.float32), xr)

    return out.reshape(N, C, H, W)  # copy-free


def _reference(x, weight, bias):
    """Pure-JAX reference (same conv-transpose-as-conv identity)."""
    N, C, H, W = x.shape
    xpad = jnp.pad(x, ((0, 0), (0, 0), (1, 1), (1, 1)))
    wf = weight[0, 0, ::-1, ::-1]
    acc = jnp.zeros((N, C, H, W), jnp.float32)
    for dy in range(3):
        for dx in range(3):
            acc = acc + wf[dy, dx] * xpad[:, :, dy:dy + H, dx:dx + W]
    acc = acc + bias[0]
    return jnp.where(acc > 0, acc, acc * 0.1)


if __name__ == "__main__":
    key = jax.random.PRNGKey(0)
    kx, kw, kb, kx2 = jax.random.split(key, 4)

    # Literal shapes from the PyTorch module: x3 = torch.randn(1, 1, 16, 16),
    # ConvTranspose2d(1, 1, kernel_size=3, stride=1, padding=1).
    x = jax.random.normal(kx, (1, 1, 16, 16), dtype=jnp.float32)
    weight = jax.random.normal(kw, (1, 1, 3, 3), dtype=jnp.float32) * 0.3
    bias = jax.random.normal(kb, (1,), dtype=jnp.float32) * 0.1

    y = conv_transpose_leaky(x, weight, bias)
    jax.block_until_ready(y)
    assert y.shape == x.shape
    assert jnp.allclose(y, _reference(x, weight, bias), atol=1e-5), "mismatch (N=1)"

    # Batched case: 8 planes -> 4 planes per tile, 2 grid steps, exercising the
    # in-kernel lane packing, lane zero-padding, and multi-step grid.
    xb = jax.random.normal(kx2, (8, 1, 16, 16), dtype=jnp.float32)
    yb = conv_transpose_leaky(xb, weight, bias)
    jax.block_until_ready(yb)
    assert jnp.allclose(yb, _reference(xb, weight, bias), atol=1e-5), "mismatch (N=8)"

    print("KERNEL_OK")
</pallas_src>

<mosaic_0001>
module attributes {stable_mosaic.version = 11 : i64} {
  func.func @_convt_leaky_kernel(%arg0: i32, %arg1: memref<3x3xf32, #tpu.memory_space<smem>>, %arg2: memref<1xf32, #tpu.memory_space<smem>>, %arg3: memref<1x16x16xf32, #tpu.memory_space<vmem>>, %arg4: memref<1x16x16xf32, #tpu.memory_space<vmem>>) attributes {dimension_semantics = [#tpu.dimension_semantics<parallel>], iteration_bounds = array<i64: 1>, scalar_prefetch = 0 : i64, scratch_operands = 0 : i64, tpu.core_type = #tpu.core_type<tc>, window_params = [{transform_indices = @transform_0, window_bounds = array<i64: 3, 3>}, {transform_indices = @transform_1, window_bounds = array<i64: 1>}, {transform_indices = @transform_2, window_bounds = array<i64: 1, 16, 16>}, {transform_indices = @transform_3, window_bounds = array<i64: 1, 16, 16>}]} {
    %c0 = arith.constant 0 : index
    %c0_0 = arith.constant 0 : index
    %c0_1 = arith.constant 0 : index
    %0 = vector.load %arg3[%c0, %c0_0, %c0_1] : memref<1x16x16xf32, #tpu.memory_space<vmem>>, vector<1x16x16xf32>
    %1 = vector.shape_cast %0 : vector<1x16x16xf32> to vector<16x16xf32>
    %cst = arith.constant 0.000000e+00 : f32
    %2 = vector.broadcast %cst : f32 to vector<16x112xf32>
    %3 = tpu.concatenate %1, %2 in 1 : vector<16x16xf32>, vector<16x112xf32> -> vector<16x128xf32>
    %4 = tpu.iota {dimensions = array<i32: 0>} : vector<16x128xi32>
    %5 = tpu.iota {dimensions = array<i32: 1>} : vector<16x128xi32>
    %c16_i32 = arith.constant 16 : i32
    %c0_i32 = arith.constant 0 : i32
    %6 = arith.cmpi eq, %c16_i32, %c0_i32 : i32
    %c1_i32 = arith.constant 1 : i32
    %7 = arith.select %6, %c1_i32, %c16_i32 : i32
    %8 = vector.broadcast %7 : i32 to vector<16x128xi32>
    %9 = arith.remsi %5, %8 : vector<16x128xi32>
    %c0_i32_2 = arith.constant 0 : i32
    %10 = vector.broadcast %c0_i32_2 : i32 to vector<16x128xi32>
    %11 = arith.cmpi ne, %9, %10 : vector<16x128xi32>
    %c0_i32_3 = arith.constant 0 : i32
    %12 = vector.broadcast %c0_i32_3 : i32 to vector<16x128xi32>
    %13 = arith.cmpi slt, %9, %12 : vector<16x128xi32>
    %c0_i32_4 = arith.constant 0 : i32
    %14 = arith.cmpi slt, %7, %c0_i32_4 : i32
    %15 = vector.broadcast %14 : i1 to vector<16x128xi1>
    %16 = vector.broadcast %15 : vector<16x128xi1> to vector<16x128xi1>
    %17 = arith.xori %13, %16 : vector<16x128xi1>
    %18 = arith.andi %17, %11 : vector<16x128xi1>
    %19 = vector.broadcast %7 : i32 to vector<16x128xi32>
    %20 = arith.addi %9, %19 : vector<16x128xi32>
    %21 = arith.select %18, %20, %9 : vector<16x128xi1>, vector<16x128xi32>
    %c0_i32_5 = arith.constant 0 : i32
    %22 = vector.broadcast %c0_i32_5 : i32 to vector<16x128xi32>
    %23 = arith.cmpi ne, %4, %22 : vector<16x128xi32>
    %c15_i32 = arith.constant 15 : i32
    %24 = vector.broadcast %c15_i32 : i32 to vector<16x128xi32>
    %25 = arith.cmpi ne, %4, %24 : vector<16x128xi32>
    %c0_i32_6 = arith.constant 0 : i32
    %26 = vector.broadcast %c0_i32_6 : i32 to vector<16x128xi32>
    %27 = arith.cmpi ne, %21, %26 : vector<16x128xi32>
    %c15_i32_7 = arith.constant 15 : i32
    %28 = vector.broadcast %c15_i32_7 : i32 to vector<16x128xi32>
    %29 = arith.cmpi ne, %21, %28 : vector<16x128xi32>
    %c1_i32_8 = arith.constant 1 : i32
    %30 = tpu.dynamic_rotate %3 by %c1_i32_8 dim 0 : vector<16x128xf32>, i32 -> vector<16x128xf32>
    %cst_9 = arith.constant 0.000000e+00 : f32
    %31 = vector.broadcast %cst_9 : f32 to vector<16x128xf32>
    %32 = arith.select %23, %30, %31 : vector<16x128xi1>, vector<16x128xf32>
    %c15_i32_10 = arith.constant 15 : i32
    %33 = tpu.dynamic_rotate %3 by %c15_i32_10 dim 0 : vector<16x128xf32>, i32 -> vector<16x128xf32>
    %cst_11 = arith.constant 0.000000e+00 : f32
    %34 = vector.broadcast %cst_11 : f32 to vector<16x128xf32>
    %35 = arith.select %25, %33, %34 : vector<16x128xi1>, vector<16x128xf32>
    %c0_12 = arith.constant 0 : index
    %c0_13 = arith.constant 0 : index
    %36 = memref.load %arg1[%c0_12, %c0_13] : memref<3x3xf32, #tpu.memory_space<smem>>
    %37 = vector.broadcast %36 : f32 to vector<16x128xf32>
    %38 = arith.mulf %37, %32 : vector<16x128xf32>
    %c1 = arith.constant 1 : index
    %c0_14 = arith.constant 0 : index
    %39 = memref.load %arg1[%c1, %c0_14] : memref<3x3xf32, #tpu.memory_space<smem>>
    %40 = vector.broadcast %39 : f32 to vector<16x128xf32>
    %41 = arith.mulf %40, %3 : vector<16x128xf32>
    %42 = arith.addf %38, %41 : vector<16x128xf32>
    %c2 = arith.constant 2 : index
    %c0_15 = arith.constant 0 : index
    %43 = memref.load %arg1[%c2, %c0_15] : memref<3x3xf32, #tpu.memory_space<smem>>
    %44 = vector.broadcast %43 : f32 to vector<16x128xf32>
    %45 = arith.mulf %44, %35 : vector<16x128xf32>
    %46 = arith.addf %42, %45 : vector<16x128xf32>
    %c0_16 = arith.constant 0 : index
    %c1_17 = arith.constant 1 : index
    %47 = memref.load %arg1[%c0_16, %c1_17] : memref<3x3xf32, #tpu.memory_space<smem>>
    %48 = vector.broadcast %47 : f32 to vector<16x128xf32>
    %49 = arith.mulf %48, %32 : vector<16x128xf32>
    %c1_18 = arith.constant 1 : index
    %c1_19 = arith.constant 1 : index
    %50 = memref.load %arg1[%c1_18, %c1_19] : memref<3x3xf32, #tpu.memory_space<smem>>
    %51 = vector.broadcast %50 : f32 to vector<16x128xf32>
    %52 = arith.mulf %51, %3 : vector<16x128xf32>
    %53 = arith.addf %49, %52 : vector<16x128xf32>
    %c2_20 = arith.constant 2 : index
    %c1_21 = arith.constant 1 : index
    %54 = memref.load %arg1[%c2_20, %c1_21] : memref<3x3xf32, #tpu.memory_space<smem>>
    %55 = vector.broadcast %54 : f32 to vector<16x128xf32>
    %56 = arith.mulf %55, %35 : vector<16x128xf32>
    %57 = arith.addf %53, %56 : vector<16x128xf32>
    %c0_22 = arith.constant 0 : index
    %58 = memref.load %arg2[%c0_22] : memref<1xf32, #tpu.memory_space<smem>>
    %59 = vector.broadcast %58 : f32 to vector<16x128xf32>
    %60 = arith.addf %57, %59 : vector<16x128xf32>
    %c0_23 = arith.constant 0 : index
    %c2_24 = arith.constant 2 : index
    %61 = memref.load %arg1[%c0_23, %c2_24] : memref<3x3xf32, #tpu.memory_space<smem>>
    %62 = vector.broadcast %61 : f32 to vector<16x128xf32>
    %63 = arith.mulf %62, %32 : vector<16x128xf32>
    %c1_25 = arith.constant 1 : index
    %c2_26 = arith.constant 2 : index
    %64 = memref.load %arg1[%c1_25, %c2_26] : memref<3x3xf32, #tpu.memory_space<smem>>
    %65 = vector.broadcast %64 : f32 to vector<16x128xf32>
    %66 = arith.mulf %65, %3 : vector<16x128xf32>
    %67 = arith.addf %63, %66 : vector<16x128xf32>
    %c2_27 = arith.constant 2 : index
    %c2_28 = arith.constant 2 : index
    %68 = memref.load %arg1[%c2_27, %c2_28] : memref<3x3xf32, #tpu.memory_space<smem>>
    %69 = vector.broadcast %68 : f32 to vector<16x128xf32>
    %70 = arith.mulf %69, %35 : vector<16x128xf32>
    %71 = arith.addf %67, %70 : vector<16x128xf32>
    %c1_i32_29 = arith.constant 1 : i32
    %72 = tpu.dynamic_rotate %46 by %c1_i32_29 dim 1 : vector<16x128xf32>, i32 -> vector<16x128xf32>
    %cst_30 = arith.constant 0.000000e+00 : f32
    %73 = vector.broadcast %cst_30 : f32 to vector<16x128xf32>
    %74 = arith.select %27, %72, %73 : vector<16x128xi1>, vector<16x128xf32>
    %75 = arith.addf %60, %74 : vector<16x128xf32>
    %c127_i32 = arith.constant 127 : i32
    %76 = tpu.dynamic_rotate %71 by %c127_i32 dim 1 : vector<16x128xf32>, i32 -> vector<16x128xf32>
    %cst_31 = arith.constant 0.000000e+00 : f32
    %77 = vector.broadcast %cst_31 : f32 to vector<16x128xf32>
    %78 = arith.select %29, %76, %77 : vector<16x128xi1>, vector<16x128xf32>
    %79 = arith.addf %75, %78 : vector<16x128xf32>
    %cst_32 = arith.constant 0.000000e+00 : f32
    %80 = vector.broadcast %cst_32 : f32 to vector<16x128xf32>
    %81 = arith.cmpf ogt, %79, %80 : vector<16x128xf32>
    %cst_33 = arith.constant 1.000000e-01 : f32
    %82 = vector.broadcast %cst_33 : f32 to vector<16x128xf32>
    %83 = arith.mulf %79, %82 : vector<16x128xf32>
    %84 = arith.select %81, %79, %83 : vector<16x128xi1>, vector<16x128xf32>
    %85 = vector.extract_strided_slice %84 {offsets = [0, 0], sizes = [16, 16], strides = [1, 1]} : vector<16x128xf32> to vector<16x16xf32>
    %c0_34 = arith.constant 0 : index
    %c0_35 = arith.constant 0 : index
    %c0_36 = arith.constant 0 : index
    %86 = vector.load %arg4[%c0_34, %c0_35, %c0_36] : memref<1x16x16xf32, #tpu.memory_space<vmem>>, vector<1x16x16xf32>
    %87 = vector.shape_cast %86 : vector<1x16x16xf32> to vector<16x16xf32>
    %88 = vector.shape_cast %85 : vector<16x16xf32> to vector<1x16x16xf32>
    tpu.vector_store %arg4[%c0_34, %c0_35, %c0_36], %88 {strides = array<i32>} : memref<1x16x16xf32, #tpu.memory_space<vmem>>, vector<1x16x16xf32>,
    return
  }
  func.func @transform_0(%arg0: i32) -> (i32, i32) {
    %c0_i32 = arith.constant 0 : i32
    %c0_i32_0 = arith.constant 0 : i32
    %c0_i32_1 = arith.constant 0 : i32
    return %c0_i32, %c0_i32_0 : i32, i32
  }
  func.func @transform_1(%arg0: i32) -> i32 {
    %c0_i32 = arith.constant 0 : i32
    %c0_i32_0 = arith.constant 0 : i32
    return %c0_i32 : i32
  }
  func.func @transform_2(%arg0: i32) -> (i32, i32, i32) {
    %c0_i32 = arith.constant 0 : i32
    %c0_i32_0 = arith.constant 0 : i32
    %c0_i32_1 = arith.constant 0 : i32
    return %arg0, %c0_i32, %c0_i32_0 : i32, i32, i32
  }
  func.func @transform_3(%arg0: i32) -> (i32, i32, i32) {
    %c0_i32 = arith.constant 0 : i32
    %c0_i32_0 = arith.constant 0 : i32
    %c0_i32_1 = arith.constant 0 : i32
    return %arg0, %c0_i32, %c0_i32_0 : i32, i32, i32
  }
}

</mosaic_0001>

<bundles_post_ra>
// kernel: conv_transpose_leaky.1
= control target key start
LH: loop header
LB: loop body
LE: loop exit
PB: predicated region body
PF: predicated region fallthrough
CT: control target
= control target key end

     0   :  { %9 = vsyncpa [#allocation5], 0  ;;  %s278_s0 = inlined_call_operand.vmem [shape: f32[3,3], index: 0, kind: input, shape index: {}]   ;;  %s279_s1 = inlined_call_operand.<no memory space> [shape: f32[1], index: 1, kind: input, shape index: {}]   ;;  %s280_s2 = inlined_call_operand.vmem [shape: f32[1,16,16], index: 2, kind: input, shape index: {}]   ;;  %s281_s3 = inlined_call_operand.hbm [shape: f32[1,16,16], index: 3, kind: output, shape index: {}]  }
   0x1   :  { %10 = vsyncpa [#allocation4], 0  ;;  %s17_s14 = sshll.u32 %s278_s0, 4  ;;  %s18_s14 = int_to_ptr.vmem [resolvable:$true] %s17_s14 }
   0x2   :  { %s178_s15 = scalar_lea.vmem %s18_s14, 64  ;;  %p183_p1 = scmp.lt.s32.totalorder %s18_s14, %s18_s14 }
   0x3   :  { %p179_p0 = scmp.ne.s32.totalorder %s18_s14, %s178_s15  ;;  %p184_p2 = scmp.lt.s32.totalorder %s178_s15, %s178_s15 }
   0x5   :  { %p185_p3 = por %p184_p2, %p183_p1 }
   0x7   :  { %p186_p4 = pnand %p185_p3, %p179_p0 }
   0x9   :  { %189 = shalt.err (!%p186_p4)
}
   0xa   :  { %s214_s16 = smov [#allocation3]  }
   0xb   :  { %20 = dma.vmem_to_smem %s18_s14, 64, %s214_s16, [#allocation5]  }
   0xc   :  { %210 = dma.done.wait [#allocation5], 64  }
   0xd   :  { %211 = vsyncadd [#allocation5], 4294967232 }
   0xe   :  { %28 = sfence }
   0xf   :  { %v29_v0 = vld [vmem:[%s280_s2] sm:$0xff]  ;;  %v30_v1 = vld [vmem:[%s280_s2 + $0x8] sm:$0xff]  ;;  %vm31_vm0 = vcmask 130048   ;;  %v34_v2 = vlaneseq  ;;  %s71_s0 = sld [smem:[#allocation3]]  ;;  %s215_s28 = smov 1   ;;  %v104_v58 = vstv %s279_s1 }
  0x10   :  { %v32_v3 = vsel %vm31_vm0, %v29_v0, 0.0  ;;  %v33_v4 = vsel %vm31_vm0, %v30_v1, 0.0  ;;  %s164_s21 = sld [smem:[#allocation3 + $0x80]]  ;;  %s216_s29 = smov 127  }
  0x11   :  { %v35_v5 = vshrl.u32 %v34_v2, 7  ;;  %v57_v6 = vrot.slane %v32_v3, 7  ;;  %v58_v7 = vrot.slane %v33_v4, 7  ;;  %v64_v8 = vrot.slane %v32_v3, 1  ;;  %s165_s22 = sld [smem:[#allocation3 + $0x100]]  ;;  %s217_s1 = smov [#allocation6]  }
  0x12   :  { %v65_v9 = vrot.slane %v33_v4, 1  ;;  %s252_s23 = sld [smem:[#allocation3 + $0x2]]  ;;  %v38_v56 = vand.u32 127, %v34_v2  ;;  %s152_s5 = sshll.u32 %s217_s1, 4  ;;  %s153_s5 = int_to_ptr.vmem [resolvable:$true] %s152_s5 }
  0x13   :  { %v36_v10 = vadd.s32 8, %v35_v5  ;;  %vm51_vm1 = vcmp.ne.s32.totalorder %v35_v5, 0  ;;  %vm59_vm2 = vcmp.lt.s32.totalorder %v35_v5, 1  ;;  %vm66_vm3 = vcmp.lt.s32.totalorder %v35_v5, 7  ;;  %s170_s2 = sld [smem:[#allocation3 + $0x82]]  ;;  %s190_s6 = scalar_lea.vmem %s153_s5, 256 }
  0x14   :  { %v61_v11 = vsel %vm59_vm2, %v58_v7, %v57_v6  ;;  %v68_v12 = vsel %vm66_vm3, %v65_v9, %v64_v8  ;;  %v60_v13 = vsel %vm59_vm2, %v57_v6, %v58_v7  ;;  %s171_s24 = sld [smem:[#allocation3 + $0x102]]  ;;  %v67_v15 = vsel %vm66_vm3, %v64_v8, %v65_v9  ;;  %p191_p5 = scmp.ne.s32.totalorder %s153_s5, %s190_s6 }
  0x15   :  { %vm54_vm4 = vcmp.ne.s32.totalorder %v36_v10, 15  ;;  %v62_v14 = vsel %vm51_vm1, %v61_v11, 0.0  ;;  %v72_v16 = vstv %s71_s0  ;;  %s254_s25 = sld [smem:[#allocation3 + $0x1]]  ;;  %v43_v57 = vand.u32 15, %v38_v56  ;;  %p195_p6 = scmp.lt.s32.totalorder %s153_s5, %s153_s5 }
  0x16   :  { %v70_v17 = vsel %vm54_vm4, %v68_v12, 0.0  ;;  %v73_v18 = vmul.f32 %v72_v16, %v62_v14  ;;  %v76_v19 = vstv %s164_s21  ;;  %v74_v20 = vmul.f32 %v72_v16, %v60_v13  ;;  %s256_s26 = sld [smem:[#allocation3 + $0x81]]  ;;  %p196_p7 = scmp.lt.s32.totalorder %s190_s6, %s190_s6 }
  0x17   :  { %v77_v21 = vmul.f32 %v76_v19, %v32_v3  ;;  %v78_v22 = vmul.f32 %v76_v19, %v33_v4  ;;  %v82_v23 = vstv %s165_s22  ;;  %s168_s27 = sld [smem:[#allocation3 + $0x101]]  ;;  %vm55_vm5 = vcmp.ne.s32.totalorder %v43_v57, 0 }
  0x18   :  { %v83_v24 = vmul.f32 %v82_v23, %v67_v15  ;;  %v84_v25 = vmul.f32 %v82_v23, %v70_v17  ;;  %v108_v26 = vstv %s252_s23  ;;  %vm265_vm6 = vcmp.ne.s32.totalorder %v43_v57, 15  ;;  %p197_p8 = por %p196_p7, %p195_p6 }
  0x19   :  { %v79_v27 = vadd.f32 %v77_v21, %v73_v18  ;;  %v109_v28 = vmul.f32 %v108_v26, %v62_v14  ;;  %v112_v29 = vstv %s170_s2  ;;  %v110_v30 = vmul.f32 %v108_v26, %v60_v13 }
  0x1a   :  { %v113_v31 = vmul.f32 %v112_v29, %v32_v3  ;;  %v114_v32 = vmul.f32 %v112_v29, %v33_v4  ;;  %v118_v33 = vstv %s171_s24  ;;  %v80_v34 = vadd.f32 %v78_v22, %v74_v20  ;;  %p198_p9 = pnand %p197_p8, %p191_p5 }
  0x1b   :  { %v85_v35 = vadd.f32 %v83_v24, %v79_v27  ;;  %v119_v36 = vmul.f32 %v118_v33, %v67_v15  ;;  %v88_v37 = vstv %s254_s25  ;;  %v120_v39 = vmul.f32 %v118_v33, %v70_v17 }
  0x1c   :  { %v115_v38 = vadd.f32 %v113_v31, %v109_v28  ;;  %v116_v40 = vadd.f32 %v114_v32, %v110_v30  ;;  %v89_v41 = vmul.f32 %v88_v37, %v62_v14  ;;  %v86_v42 = vadd.f32 %v84_v25, %v80_v34 }
  0x1d   :  { %123 = vrot.lane.b32.xlu0 %v85_v35, %s215_s28  ;;  %v92_v43 = vstv %s256_s26  ;;  %v98_v44 = vstv %s168_s27  ;;  %v90_v45 = vmul.f32 %v88_v37, %v60_v13 }
  0x1e   :  { %v121_v46 = vadd.f32 %v119_v36, %v115_v38  ;;  %v93_v47 = vmul.f32 %v92_v43, %v32_v3  ;;  %v99_v48 = vmul.f32 %v98_v44, %v67_v15  ;;  %v94_v49 = vmul.f32 %v92_v43, %v33_v4 }
  0x1f   :  { %v100_v50 = vmul.f32 %v98_v44, %v70_v17  ;;  %v122_v51 = vadd.f32 %v120_v39, %v116_v40 }
  0x20   :  { %131 = vrot.lane.b32.xlu1 %v121_v46, %s216_s29  ;;  %v95_v52 = vadd.f32 %v93_v47, %v89_v41  ;;  %v96_v53 = vadd.f32 %v94_v49, %v90_v45 }
  0x21   :  { %125 = vrot.lane.b32.xlu0 %v86_v42, %s215_s28 }
  0x22   :  { %v101_v54 = vadd.f32 %v99_v48, %v95_v52  ;;  %v102_v55 = vadd.f32 %v100_v50, %v96_v53 }
  0x24   :  { %133 = vrot.lane.b32.xlu1 %v122_v51, %s216_s29  ;;  %v105_v59 = vadd.f32 %v104_v58, %v101_v54  ;;  %v106_v0 = vadd.f32 %v104_v58, %v102_v55 }
  0x8f   :  { %v124_v60 = vpop.permute.xlu0 %123 }
  0x90   :  { %v127_v61 = vsel %vm55_vm5, %v124_v60, 0.0 }
  0x91   :  { %v129_v63 = vadd.f32 %v127_v61, %v105_v59 }
  0x92   :  { %v132_v1 = vpop.permute.xlu1 %131 }
  0x93   :  { %v135_v3 = vsel %vm265_vm6, %v132_v1, 0.0  ;;  %v126_v2 = vpop.permute.xlu0 %125 }
  0x94   :  { %v137_v4 = vadd.f32 %v135_v3, %v129_v63  ;;  %v128_v5 = vsel %vm55_vm5, %v126_v2, 0.0 }
  0x95   :  { %v130_v6 = vadd.f32 %v128_v5, %v106_v0 }
  0x96   :  { %vm139_vm7 = vcmp.gt.f32.partialorder %v137_v4, 0.0  ;;  %v141_v7 = vmul.f32 0.1, %v137_v4  ;;  %v134_v8 = vpop.permute.xlu1 %133 }
  0x97   :  { %v136_v9 = vsel %vm265_vm6, %v134_v8, 0.0 }
  0x98   :  { %v143_v10 = vsel %vm139_vm7, %v137_v4, %v141_v7  ;;  %v138_v11 = vadd.f32 %v136_v9, %v130_v6 }
  0x99   :  { %145 = vst.msk [vmem:[#allocation6] sm:$0xff] %vm31_vm0, %v143_v10 }
  0x9a   :  { %vm140_vm8 = vcmp.gt.f32.partialorder %v138_v11, 0.0  ;;  %v142_v12 = vmul.f32 0.1, %v138_v11 }
  0x9c   :  { %v144_v13 = vsel %vm140_vm8, %v138_v11, %v142_v12 }
  0x9d   :  { %146 = vst.msk [vmem:[#allocation6 + $0x8] sm:$0xff] %vm31_vm0, %v144_v13 }
  0x9e   :  { %201 = shalt.err (!%p198_p9)
}
  0x9f   :  { %s218_s7 = smov 128   ;;  %s219_s8 = smov 8  }
  0xa0   :  { %158 = dma.vmem_to_hbm [thread:$0]  %s153_s5, 256, %s281_s3, [#allocation4], %s218_s7, %s218_s7, %s219_s8  }
  0xa1   :  { %212 = dma.done.wait [#allocation4], 256  }
  0xa2   :  { %213 = vsyncadd [#allocation4], 4294967040 }
  0xa3   :  { %162 = vsyncpa [#allocation4], 1 }
  0xa4   :  { %163 = vsyncpa [#allocation5], 1 }

</bundles_post_ra>
